<compile_context>
chip_gen: v7x
topology: tpu7x:2x2x1
jax: 0.10.0
libtpu: 0.0.40
codegen_flags: <defaults>
</compile_context>

<pallas_src>
import functools

import jax
import jax.numpy as jnp
from jax.experimental import pallas as pl
from jax.experimental.pallas import tpu as pltpu

F = 128            # padded feature half-width (lane-dense)
BIAS = F - 1       # constant-1 lane used to fold biases into the matmuls


def _round_up(x, m):
    return (x + m - 1) // m * m


def _pick_row_tile(rows):
    """Row tile: single step for tiny batches, else >=2 steps, capped at 512."""
    if rows <= 128:
        return rows
    return min(512, _round_up(rows // 2, 8))


def _layer_dims(inp, out1, out2, out3):
    # (fan_in, fan_out) of the 9 Linear layers, in PyTorch-module order.
    return [
        (inp, 10), (10, 15),     # lin_1
        (15, 10), (10, out1),    # out1 head
        (15, 10), (10, 15),      # lin_2
        (15, 10), (10, out2),    # out2 head
        (15, out3),              # final linear (no ReLU)
    ]


def init_raw_params(key, inp=20, out1=50, out2=50, out3=50):
    """PyTorch-default Linear init; returns [(W(fi,fo), b(fo)), ...] in f32."""
    dims = _layer_dims(inp, out1, out2, out3)
    keys = jax.random.split(key, 2 * len(dims))
    params = []
    for i, (fi, fo) in enumerate(dims):
        bound = 1.0 / (fi ** 0.5)
        w = jax.random.uniform(keys[2 * i], (fi, fo), jnp.float32, -bound, bound)
        b = jax.random.uniform(keys[2 * i + 1], (fo,), jnp.float32, -bound, bound)
        params.append((w, b))
    return params


def pack_params(raw, inp, out1, out2, out3):
    """Pack the 9 (W, b) pairs into 6 fused, bias-folded, zero-padded bf16 slabs.

    Zero padding outside the real (fan_in, fan_out) blocks is what keeps the
    padded lanes exactly 0 through every layer (re-pack through this function
    when loading externally trained weights).
    """
    assert inp <= BIAS and max(out1, out2, out3) <= BIAS, \
        "feature dims must fit within 127 lanes (lane 127 is the bias lane)"
    (w0, b0), (w1, b1), (w2, b2), (w3, b3), (w4, b4), \
        (w5, b5), (w6, b6), (w7, b7), (w8, b8) = raw

    def put(slab, w, b, r0, c0, carry_const):
        fi, fo = w.shape
        slab = slab.at[r0:r0 + fi, c0:c0 + fo].set(w)
        slab = slab.at[r0 + BIAS, c0:c0 + fo].set(b)        # bias via constant-1 lane
        if carry_const:
            slab = slab.at[r0 + BIAS, c0 + BIAS].set(1.0)   # propagate the 1-lane
        return slab

    s0 = put(jnp.zeros((F, F), jnp.float32), w0, b0, 0, 0, True)            # lin_1[0]
    s1 = put(jnp.zeros((F, F), jnp.float32), w1, b1, 0, 0, True)            # lin_1[2]
    s2 = put(put(jnp.zeros((F, 2 * F), jnp.float32),                        # out1[0] | lin_2[0]
                 w2, b2, 0, 0, True), w4, b4, 0, F, True)
    s3 = put(put(jnp.zeros((2 * F, 2 * F), jnp.float32),                    # out1[2] | lin_2[2]
                 w3, b3, 0, 0, True), w5, b5, F, F, True)
    s4 = put(put(jnp.zeros((F, 2 * F), jnp.float32),                        # out2[0] | linear
                 w6, b6, 0, 0, True), w8, b8, 0, F, False)
    s5 = put(jnp.zeros((F, F), jnp.float32), w7, b7, 0, 0, False)           # out2[2]
    return tuple(s.astype(jnp.bfloat16) for s in (s0, s1, s2, s3, s4, s5))


def _mymodel7_kernel(x_ref, s0, s1, s2, s3, s4, s5, out_ref):
    """x_ref: (TR,128) f32 with x[:,127]==1; s*: bf16 fused weight slabs;
    out_ref: (TR,384) f32 = [o1 | o2 | o3] in 128-lane slots."""

    def mm(h, w_ref):
        # bf16 operands on the MXU, f32 accumulate; biases already folded in.
        return jnp.dot(h.astype(jnp.bfloat16), w_ref[...],
                       preferred_element_type=jnp.float32)

    relu = lambda y: jnp.maximum(y, 0.0)

    t0 = relu(mm(x_ref[...], s0))          # lin_1[0]
    h1 = relu(mm(t0, s1))                  # lin_1[2]
    t24 = relu(mm(h1, s2))                 # [out1[0](h1) | lin_2[0](h1)]
    y35 = relu(mm(t24, s3))                # [o1          | h2          ]
    h2 = y35[:, F:]
    y68 = mm(h2, s4)                       # [out2[0](h2) | linear(h2)  ]
    t6 = relu(y68[:, :F])
    o2 = relu(mm(t6, s5))                  # out2[2]

    out_ref[:, 0:F] = y35[:, :F]           # o1 (ReLU already applied)
    out_ref[:, F:2 * F] = o2               # o2
    out_ref[:, 2 * F:3 * F] = y68[:, F:]   # o3 (no ReLU)


@functools.partial(jax.jit, static_argnames=("out1", "out2", "out3"))
def mymodel7(x, slabs, *, out1, out2, out3):
    batch, in_feat = x.shape
    rows = _round_up(max(batch, 8), 8)
    tr = _pick_row_tile(rows)
    rows = _round_up(rows, tr)

    # Zero-pad rows/lanes; lane 127 is the constant-1 bias lane.
    xp = jnp.zeros((rows, F), jnp.float32)
    xp = xp.at[:batch, :in_feat].set(x.astype(jnp.float32))
    xp = xp.at[:, BIAS].set(1.0)

    # Weight slabs: whole-array, VMEM-resident, single-buffered (fetched once).
    vmem_resident = pl.BlockSpec(memory_space=pltpu.MemorySpace.VMEM)

    out = pl.pallas_call(
        _mymodel7_kernel,
        out_shape=jax.ShapeDtypeStruct((rows, 3 * F), jnp.float32),
        grid=(rows // tr,),
        in_specs=[pl.BlockSpec((tr, F), lambda i: (i, 0))] + [vmem_resident] * 6,
        out_specs=pl.BlockSpec((tr, 3 * F), lambda i: (i, 0)),
        compiler_params=pltpu.CompilerParams(
            dimension_semantics=("parallel",)),
    )(xp, *slabs)

    return (out[:batch, 0:out1],
            out[:batch, F:F + out2],
            out[:batch, 2 * F:2 * F + out3])


def mymodel7_reference(x, raw):
    """Pure-JAX f32 reference matching the PyTorch forward."""
    def lin(h, i, relu=True):
        w, b = raw[i]
        y = h @ w + b
        return jnp.maximum(y, 0.0) if relu else y

    h1 = lin(lin(x, 0), 1)
    o1 = lin(lin(h1, 2), 3)
    h2 = lin(lin(h1, 4), 5)
    o2 = lin(lin(h2, 6), 7)
    o3 = lin(h2, 8, relu=False)
    return o1, o2, o3


if __name__ == "__main__":
    key = jax.random.PRNGKey(0)
    kx, kp = jax.random.split(key)

    INP, OUT1, OUT2, OUT3 = 20, 50, 50, 50   # MyModel7(inp=20, out1/2/3=50)
    BATCH = 4

    x = jax.random.normal(kx, (BATCH, INP), dtype=jnp.float32)
    raw = init_raw_params(kp, INP, OUT1, OUT2, OUT3)
    slabs = pack_params(raw, INP, OUT1, OUT2, OUT3)

    o1, o2, o3 = mymodel7(x, slabs, out1=OUT1, out2=OUT2, out3=OUT3)
    jax.block_until_ready((o1, o2, o3))

    assert o1.shape == (BATCH, OUT1), o1.shape
    assert o2.shape == (BATCH, OUT2), o2.shape
    assert o3.shape == (BATCH, OUT3), o3.shape
    assert bool(jnp.all(o1 >= 0.0))   # out1 head ends in ReLU
    assert bool(jnp.all(o2 >= 0.0))   # out2 head ends in ReLU

    # Validate against the f32 reference (relaxed tolerance: bf16 weights/acts).
    r1, r2, r3 = mymodel7_reference(x, raw)
    for got, want in ((o1, r1), (o2, r2), (o3, r3)):
        err = float(jnp.max(jnp.abs(got - want)))
        assert err < 0.15, f"max abs err {err}"

    print("KERNEL_OK")
</pallas_src>

<mosaic_0001>
module attributes {stable_mosaic.version = 11 : i64} {
  func.func @_mymodel7_kernel(%arg0: i32, %arg1: memref<8x128xf32, #tpu.memory_space<vmem>>, %arg2: memref<128x128xbf16, #tpu.memory_space<vmem>>, %arg3: memref<128x128xbf16, #tpu.memory_space<vmem>>, %arg4: memref<128x256xbf16, #tpu.memory_space<vmem>>, %arg5: memref<256x256xbf16, #tpu.memory_space<vmem>>, %arg6: memref<128x256xbf16, #tpu.memory_space<vmem>>, %arg7: memref<128x128xbf16, #tpu.memory_space<vmem>>, %arg8: memref<8x384xf32, #tpu.memory_space<vmem>>) attributes {dimension_semantics = [#tpu.dimension_semantics<parallel>], iteration_bounds = array<i64: 1>, scalar_prefetch = 0 : i64, scratch_operands = 0 : i64, tpu.core_type = #tpu.core_type<tc>, window_params = [{transform_indices = @transform_0, window_bounds = array<i64: 8, 128>}, {pipeline_mode = #tpu.pipeline_mode<synchronous>, transform_indices = @transform_1, window_bounds = array<i64: 128, 128>}, {pipeline_mode = #tpu.pipeline_mode<synchronous>, transform_indices = @transform_2, window_bounds = array<i64: 128, 128>}, {pipeline_mode = #tpu.pipeline_mode<synchronous>, transform_indices = @transform_3, window_bounds = array<i64: 128, 256>}, {pipeline_mode = #tpu.pipeline_mode<synchronous>, transform_indices = @transform_4, window_bounds = array<i64: 256, 256>}, {pipeline_mode = #tpu.pipeline_mode<synchronous>, transform_indices = @transform_5, window_bounds = array<i64: 128, 256>}, {pipeline_mode = #tpu.pipeline_mode<synchronous>, transform_indices = @transform_6, window_bounds = array<i64: 128, 128>}, {transform_indices = @transform_7, window_bounds = array<i64: 8, 384>}]} {
    %c0 = arith.constant 0 : index
    %c0_0 = arith.constant 0 : index
    %0 = vector.load %arg1[%c0, %c0_0] : memref<8x128xf32, #tpu.memory_space<vmem>>, vector<8x128xf32>
    %1 = arith.truncf %0 : vector<8x128xf32> to vector<8x128xbf16>
    %c0_1 = arith.constant 0 : index
    %c0_2 = arith.constant 0 : index
    %2 = vector.load %arg2[%c0_1, %c0_2] : memref<128x128xbf16, #tpu.memory_space<vmem>>, vector<128x128xbf16>
    %cst = arith.constant dense<0.000000e+00> : vector<8x128xf32>
    %3 = tpu.matmul %1, %2, %cst {dimension_numbers = #tpu.dot_dimension_numbers<[1], [0], [0], [1], [0, 0, 1, 1], [], []>} : vector<8x128xbf16>, vector<128x128xbf16>, vector<8x128xf32> -> vector<8x128xf32>
    %cst_3 = arith.constant 0.000000e+00 : f32
    %4 = vector.broadcast %cst_3 : f32 to vector<8x128xf32>
    %5 = arith.maximumf %3, %4 : vector<8x128xf32>
    %6 = arith.truncf %5 : vector<8x128xf32> to vector<8x128xbf16>
    %c0_4 = arith.constant 0 : index
    %c0_5 = arith.constant 0 : index
    %7 = vector.load %arg3[%c0_4, %c0_5] : memref<128x128xbf16, #tpu.memory_space<vmem>>, vector<128x128xbf16>
    %cst_6 = arith.constant dense<0.000000e+00> : vector<8x128xf32>
    %8 = tpu.matmul %6, %7, %cst_6 {dimension_numbers = #tpu.dot_dimension_numbers<[1], [0], [0], [1], [0, 0, 1, 1], [], []>} : vector<8x128xbf16>, vector<128x128xbf16>, vector<8x128xf32> -> vector<8x128xf32>
    %cst_7 = arith.constant 0.000000e+00 : f32
    %9 = vector.broadcast %cst_7 : f32 to vector<8x128xf32>
    %10 = arith.maximumf %8, %9 : vector<8x128xf32>
    %11 = arith.truncf %10 : vector<8x128xf32> to vector<8x128xbf16>
    %c0_8 = arith.constant 0 : index
    %c0_9 = arith.constant 0 : index
    %12 = vector.load %arg4[%c0_8, %c0_9] : memref<128x256xbf16, #tpu.memory_space<vmem>>, vector<128x256xbf16>
    %cst_10 = arith.constant dense<0.000000e+00> : vector<8x256xf32>
    %13 = tpu.matmul %11, %12, %cst_10 {dimension_numbers = #tpu.dot_dimension_numbers<[1], [0], [0], [1], [0, 0, 1, 1], [], []>} : vector<8x128xbf16>, vector<128x256xbf16>, vector<8x256xf32> -> vector<8x256xf32>
    %cst_11 = arith.constant 0.000000e+00 : f32
    %14 = vector.broadcast %cst_11 : f32 to vector<8x256xf32>
    %15 = arith.maximumf %13, %14 : vector<8x256xf32>
    %16 = arith.truncf %15 : vector<8x256xf32> to vector<8x256xbf16>
    %c0_12 = arith.constant 0 : index
    %c0_13 = arith.constant 0 : index
    %17 = vector.load %arg5[%c0_12, %c0_13] : memref<256x256xbf16, #tpu.memory_space<vmem>>, vector<256x256xbf16>
    %cst_14 = arith.constant dense<0.000000e+00> : vector<8x256xf32>
    %18 = tpu.matmul %16, %17, %cst_14 {dimension_numbers = #tpu.dot_dimension_numbers<[1], [0], [0], [1], [0, 0, 1, 1], [], []>} : vector<8x256xbf16>, vector<256x256xbf16>, vector<8x256xf32> -> vector<8x256xf32>
    %cst_15 = arith.constant 0.000000e+00 : f32
    %19 = vector.broadcast %cst_15 : f32 to vector<8x256xf32>
    %20 = arith.maximumf %18, %19 : vector<8x256xf32>
    %21 = vector.extract_strided_slice %20 {offsets = [0, 128], sizes = [8, 128], strides = [1, 1]} : vector<8x256xf32> to vector<8x128xf32>
    %22 = arith.truncf %21 : vector<8x128xf32> to vector<8x128xbf16>
    %c0_16 = arith.constant 0 : index
    %c0_17 = arith.constant 0 : index
    %23 = vector.load %arg6[%c0_16, %c0_17] : memref<128x256xbf16, #tpu.memory_space<vmem>>, vector<128x256xbf16>
    %cst_18 = arith.constant dense<0.000000e+00> : vector<8x256xf32>
    %24 = tpu.matmul %22, %23, %cst_18 {dimension_numbers = #tpu.dot_dimension_numbers<[1], [0], [0], [1], [0, 0, 1, 1], [], []>} : vector<8x128xbf16>, vector<128x256xbf16>, vector<8x256xf32> -> vector<8x256xf32>
    %25 = vector.extract_strided_slice %24 {offsets = [0, 0], sizes = [8, 128], strides = [1, 1]} : vector<8x256xf32> to vector<8x128xf32>
    %cst_19 = arith.constant 0.000000e+00 : f32
    %26 = vector.broadcast %cst_19 : f32 to vector<8x128xf32>
    %27 = arith.maximumf %25, %26 : vector<8x128xf32>
    %28 = arith.truncf %27 : vector<8x128xf32> to vector<8x128xbf16>
    %c0_20 = arith.constant 0 : index
    %c0_21 = arith.constant 0 : index
    %29 = vector.load %arg7[%c0_20, %c0_21] : memref<128x128xbf16, #tpu.memory_space<vmem>>, vector<128x128xbf16>
    %cst_22 = arith.constant dense<0.000000e+00> : vector<8x128xf32>
    %30 = tpu.matmul %28, %29, %cst_22 {dimension_numbers = #tpu.dot_dimension_numbers<[1], [0], [0], [1], [0, 0, 1, 1], [], []>} : vector<8x128xbf16>, vector<128x128xbf16>, vector<8x128xf32> -> vector<8x128xf32>
    %cst_23 = arith.constant 0.000000e+00 : f32
    %31 = vector.broadcast %cst_23 : f32 to vector<8x128xf32>
    %32 = arith.maximumf %30, %31 : vector<8x128xf32>
    %33 = vector.extract_strided_slice %20 {offsets = [0, 0], sizes = [8, 128], strides = [1, 1]} : vector<8x256xf32> to vector<8x128xf32>
    %c0_24 = arith.constant 0 : index
    %c0_25 = arith.constant 0 : index
    %34 = vector.load %arg8[%c0_24, %c0_25] : memref<8x384xf32, #tpu.memory_space<vmem>>, vector<8x128xf32>
    tpu.vector_store %arg8[%c0_24, %c0_25], %33 {strides = array<i32>} : memref<8x384xf32, #tpu.memory_space<vmem>>, vector<8x128xf32>,
    %c0_26 = arith.constant 0 : index
    %c128 = arith.constant 128 : index
    %35 = vector.load %arg8[%c0_26, %c128] : memref<8x384xf32, #tpu.memory_space<vmem>>, vector<8x128xf32>
    tpu.vector_store %arg8[%c0_26, %c128], %32 {strides = array<i32>} : memref<8x384xf32, #tpu.memory_space<vmem>>, vector<8x128xf32>,
    %36 = vector.extract_strided_slice %24 {offsets = [0, 128], sizes = [8, 128], strides = [1, 1]} : vector<8x256xf32> to vector<8x128xf32>
    %c0_27 = arith.constant 0 : index
    %c256 = arith.constant 256 : index
    %37 = vector.load %arg8[%c0_27, %c256] : memref<8x384xf32, #tpu.memory_space<vmem>>, vector<8x128xf32>
    tpu.vector_store %arg8[%c0_27, %c256], %36 {strides = array<i32>} : memref<8x384xf32, #tpu.memory_space<vmem>>, vector<8x128xf32>,
    return
  }
  func.func @transform_0(%arg0: i32) -> (i32, i32) {
    %c0_i32 = arith.constant 0 : i32
    %c0_i32_0 = arith.constant 0 : i32
    return %arg0, %c0_i32 : i32, i32
  }
  func.func @transform_1(%arg0: i32) -> (i32, i32) {
    %c0_i32 = arith.constant 0 : i32
    %c0_i32_0 = arith.constant 0 : i32
    %c0_i32_1 = arith.constant 0 : i32
    return %c0_i32, %c0_i32_0 : i32, i32
  }
  func.func @transform_2(%arg0: i32) -> (i32, i32) {
    %c0_i32 = arith.constant 0 : i32
    %c0_i32_0 = arith.constant 0 : i32
    %c0_i32_1 = arith.constant 0 : i32
    return %c0_i32, %c0_i32_0 : i32, i32
  }
  func.func @transform_3(%arg0: i32) -> (i32, i32) {
    %c0_i32 = arith.constant 0 : i32
    %c0_i32_0 = arith.constant 0 : i32
    %c0_i32_1 = arith.constant 0 : i32
    return %c0_i32, %c0_i32_0 : i32, i32
  }
  func.func @transform_4(%arg0: i32) -> (i32, i32) {
    %c0_i32 = arith.constant 0 : i32
    %c0_i32_0 = arith.constant 0 : i32
    %c0_i32_1 = arith.constant 0 : i32
    return %c0_i32, %c0_i32_0 : i32, i32
  }
  func.func @transform_5(%arg0: i32) -> (i32, i32) {
    %c0_i32 = arith.constant 0 : i32
    %c0_i32_0 = arith.constant 0 : i32
    %c0_i32_1 = arith.constant 0 : i32
    return %c0_i32, %c0_i32_0 : i32, i32
  }
  func.func @transform_6(%arg0: i32) -> (i32, i32) {
    %c0_i32 = arith.constant 0 : i32
    %c0_i32_0 = arith.constant 0 : i32
    %c0_i32_1 = arith.constant 0 : i32
    return %c0_i32, %c0_i32_0 : i32, i32
  }
  func.func @transform_7(%arg0: i32) -> (i32, i32) {
    %c0_i32 = arith.constant 0 : i32
    %c0_i32_0 = arith.constant 0 : i32
    return %arg0, %c0_i32 : i32, i32
  }
}

</mosaic_0001>

<bundles_post_ra>
// kernel: mymodel7.1
= control target key start
LH: loop header
LB: loop body
LE: loop exit
PB: predicated region body
PF: predicated region fallthrough
CT: control target
= control target key end

     0   :  { %12 = vsyncpa [#allocation3], 0  ;;  %s1590_s0 = inlined_call_operand.vmem [shape: f32[8,128], index: 0, kind: input, shape index: {}]   ;;  %s1591_s1 = inlined_call_operand.hbm [shape: bf16[128,128], index: 1, kind: input, shape index: {}]   ;;  %s1592_s2 = inlined_call_operand.hbm [shape: bf16[128,128], index: 2, kind: input, shape index: {}]   ;;  %s1593_s3 = inlined_call_operand.hbm [shape: bf16[128,256], index: 3, kind: input, shape index: {}]   ;;  %s1594_s4 = inlined_call_operand.hbm [shape: bf16[256,256], index: 4, kind: input, shape index: {}]   ;;  %s1595_s5 = inlined_call_operand.hbm [shape: bf16[128,256], index: 5, kind: input, shape index: {}]   ;;  %s1596_s6 = inlined_call_operand.hbm [shape: bf16[128,128], index: 6, kind: input, shape index: {}]   ;;  %s1597_s7 = inlined_call_operand.vmem [shape: f32[8,384], index: 7, kind: output, shape index: {}]  }
   0x1   :  { %13 = vsyncpa [#allocation5], 0 }
   0x2   :  { %14 = vsyncpa [#allocation8], 0 }
   0x3   :  { %15 = vsyncpa [#allocation11], 0  ;;  %s1403_s24 = smov [#allocation4]   ;;  %s1263_s28 = scalar_lea.hbm %s1592_s2, 1024 }
   0x4   :  { %s35_s25 = sshll.u32 %s1403_s24, 4  ;;  %p1264_p0 = scmp.ne.s32.totalorder %s1592_s2, %s1263_s28  ;;  %s36_s25 = int_to_ptr.vmem [resolvable:$true] %s35_s25 }
   0x5   :  { %p1267_p1 = scmp.lt.u32.totalorder %s1263_s28, %s1592_s2 }
   0x7   :  { %p1269_p2 = pnand %p1267_p1, %p1264_p0 }
   0x9   :  { %1272 = shalt.err (!%p1269_p2)
}
   0xa   :  { %s1273_s10 = scalar_lea.vmem %s36_s25, 1024  ;;  %p1278_p4 = scmp.lt.s32.totalorder %s36_s25, %s36_s25 }
   0xb   :  { %p1274_p3 = scmp.ne.s32.totalorder %s36_s25, %s1273_s10  ;;  %p1279_p5 = scmp.lt.s32.totalorder %s1273_s10, %s1273_s10 }
   0xd   :  { %p1280_p6 = por %p1279_p5, %p1278_p4 }
   0xf   :  { %p1281_p7 = pnand %p1280_p6, %p1274_p3 }
  0x11   :  { %1284 = shalt.err (!%p1281_p7)
}
  0x12   :  { %s1404_s11 = smov 64   ;;  %s1405_s12 = smov 4  }
  0x13   :  { %41 = dma.hbm_to_vmem [thread:$0]  %s1592_s2, 1024, %s36_s25, [#allocation5], %s1404_s11, %s1404_s11, %s1405_s12  }
  0x14   :  { %s1406_s15 = smov [#allocation7]   ;;  %s1407_s17 = smov [#allocation2]  }
  0x15   :  { %s59_s16 = sshll.u32 %s1406_s15, 4  ;;  %s23_s18 = sshll.u32 %s1407_s17, 4  ;;  %s60_s16 = int_to_ptr.vmem [resolvable:$true] %s59_s16  ;;  %s24_s18 = int_to_ptr.vmem [resolvable:$true] %s23_s18 }
  0x16   :  { %s1285_s21 = scalar_lea.hbm %s1594_s4, 4096 }
  0x17   :  { %p1286_p8 = scmp.ne.s32.totalorder %s1594_s4, %s1285_s21  ;;  %p1289_p9 = scmp.lt.u32.totalorder %s1285_s21, %s1594_s4 }
  0x19   :  { %p1291_p10 = pnand %p1289_p9, %p1286_p8 }
  0x1b   :  { %1294 = shalt.err (!%p1291_p10)
}
  0x1c   :  { %s1295_s2 = scalar_lea.vmem %s60_s16, 4096  ;;  %p1300_p12 = scmp.lt.s32.totalorder %s60_s16, %s60_s16 }
  0x1d   :  { %p1296_p11 = scmp.ne.s32.totalorder %s60_s16, %s1295_s2  ;;  %p1301_p13 = scmp.lt.s32.totalorder %s1295_s2, %s1295_s2 }
  0x1f   :  { %p1302_p0 = por %p1301_p13, %p1300_p12 }
  0x21   :  { %p1303_p1 = pnand %p1302_p0, %p1296_p11 }
  0x23   :  { %1306 = shalt.err (!%p1303_p1)
}
  0x24   :  { %s1408_s25 = smov 128   ;;  %s1409_s27 = smov 8  }
  0x25   :  { %65 = dma.hbm_to_vmem [thread:$0]  %s1594_s4, 4096, %s60_s16, [#allocation8], %s1408_s25, %s1408_s25, %s1409_s27  }
  0x26   :  { %s1307_s9 = scalar_lea.hbm %s1591_s1, 1024 }
  0x27   :  { %p1308_p2 = scmp.ne.s32.totalorder %s1591_s1, %s1307_s9  ;;  %p1311_p3 = scmp.lt.u32.totalorder %s1307_s9, %s1591_s1 }
  0x29   :  { %p1313_p4 = pnand %p1311_p3, %p1308_p2 }
  0x2b   :  { %1316 = shalt.err (!%p1313_p4)
}
  0x2c   :  { %s1317_s17 = scalar_lea.vmem %s24_s18, 1024  ;;  %p1322_p6 = scmp.lt.s32.totalorder %s24_s18, %s24_s18 }
  0x2d   :  { %p1318_p5 = scmp.ne.s32.totalorder %s24_s18, %s1317_s17  ;;  %p1323_p7 = scmp.lt.s32.totalorder %s1317_s17, %s1317_s17 }
  0x2f   :  { %p1324_p8 = por %p1323_p7, %p1322_p6 }
  0x31   :  { %p1325_p9 = pnand %p1324_p8, %p1318_p5 }
  0x33   :  { %1328 = shalt.err (!%p1325_p9)
}
  0x34   :  { %29 = dma.hbm_to_vmem [thread:$0]  %s1591_s1, 1024, %s24_s18, [#allocation3], %s1404_s11, %s1404_s11, %s1405_s12  }
  0x35   :  { %s1410_s19 = smov [#allocation6]   ;;  %s1411_s21 = smov [#allocation9]  }
  0x36   :  { %s47_s20 = sshll.u32 %s1410_s19, 4  ;;  %s71_s22 = sshll.u32 %s1411_s21, 4  ;;  %s48_s20 = int_to_ptr.vmem [resolvable:$true] %s47_s20  ;;  %s72_s22 = int_to_ptr.vmem [resolvable:$true] %s71_s22 }
  0x37   :  { %s1329_s26 = scalar_lea.hbm %s1593_s3, 2048 }
  0x38   :  { %p1330_p10 = scmp.ne.s32.totalorder %s1593_s3, %s1329_s26  ;;  %p1333_p11 = scmp.lt.u32.totalorder %s1329_s26, %s1593_s3 }
  0x3a   :  { %p1335_p12 = pnand %p1333_p11, %p1330_p10 }
  0x3c   :  { %1338 = shalt.err (!%p1335_p12)
}
  0x3d   :  { %s1339_s1 = scalar_lea.vmem %s48_s20, 2048  ;;  %p1344_p0 = scmp.lt.s32.totalorder %s48_s20, %s48_s20 }
  0x3e   :  { %p1340_p13 = scmp.ne.s32.totalorder %s48_s20, %s1339_s1  ;;  %p1345_p1 = scmp.lt.s32.totalorder %s1339_s1, %s1339_s1 }
  0x40   :  { %p1346_p2 = por %p1345_p1, %p1344_p0 }
  0x42   :  { %p1347_p3 = pnand %p1346_p2, %p1340_p13 }
  0x44   :  { %1350 = shalt.err (!%p1347_p3)
}
  0x45   :  { %53 = dma.hbm_to_vmem [thread:$0]  %s1593_s3, 2048, %s48_s20, [#allocation5], %s1408_s25, %s1408_s25, %s1409_s27  }
  0x46   :  { %s1351_s13 = scalar_lea.hbm %s1595_s5, 2048 }
  0x47   :  { %p1352_p4 = scmp.ne.s32.totalorder %s1595_s5, %s1351_s13  ;;  %p1355_p5 = scmp.lt.u32.totalorder %s1351_s13, %s1595_s5 }
  0x49   :  { %p1357_p6 = pnand %p1355_p5, %p1352_p4 }
  0x4b   :  { %1360 = shalt.err (!%p1357_p6)
}
  0x4c   :  { %s1361_s16 = scalar_lea.vmem %s72_s22, 2048  ;;  %p1366_p8 = scmp.lt.s32.totalorder %s72_s22, %s72_s22 }
  0x4d   :  { %p1362_p7 = scmp.ne.s32.totalorder %s72_s22, %s1361_s16  ;;  %p1367_p9 = scmp.lt.s32.totalorder %s1361_s16, %s1361_s16 }
  0x4f   :  { %p1368_p10 = por %p1367_p9, %p1366_p8 }
  0x51   :  { %p1369_p11 = pnand %p1368_p10, %p1362_p7 }
  0x53   :  { %1372 = shalt.err (!%p1369_p11)
}
  0x54   :  { %77 = dma.hbm_to_vmem [thread:$0]  %s1595_s5, 2048, %s72_s22, [#allocation8], %s1408_s25, %s1408_s25, %s1409_s27  }
  0x55   :  { %s1412_s20 = smov [#allocation10]   ;;  %s1373_s26 = scalar_lea.hbm %s1596_s6, 1024 }
  0x56   :  { %s83_s21 = sshll.u32 %s1412_s20, 4  ;;  %p1374_p12 = scmp.ne.s32.totalorder %s1596_s6, %s1373_s26  ;;  %s84_s21 = int_to_ptr.vmem [resolvable:$true] %s83_s21 }
  0x57   :  { %p1377_p13 = scmp.lt.u32.totalorder %s1373_s26, %s1596_s6 }
  0x59   :  { %p1379_p0 = pnand %p1377_p13, %p1374_p12 }
  0x5b   :  { %1382 = shalt.err (!%p1379_p0)
}
  0x5c   :  { %s1383_s1 = scalar_lea.vmem %s84_s21, 1024  ;;  %p1388_p2 = scmp.lt.s32.totalorder %s84_s21, %s84_s21 }
  0x5d   :  { %p1384_p1 = scmp.ne.s32.totalorder %s84_s21, %s1383_s1  ;;  %p1389_p3 = scmp.lt.s32.totalorder %s1383_s1, %s1383_s1 }
  0x5f   :  { %p1390_p4 = por %p1389_p3, %p1388_p2 }
  0x61   :  { %p1391_p5 = pnand %p1390_p4, %p1384_p1 }
  0x63   :  { %1394 = shalt.err (!%p1391_p5)
}
  0x64   :  { %89 = dma.hbm_to_vmem [thread:$0]  %s1596_s6, 1024, %s84_s21, [#allocation11], %s1404_s11, %s1404_s11, %s1405_s12  }
  0x65   :  { %1395 = dma.done.wait [#allocation3], 1024  }
  0x66   :  { %1396 = vsyncadd [#allocation3], 4294966272 }
  0x67   :  { %1397 = dma.done.wait [#allocation5], 3072  }
  0x68   :  { %1398 = vsyncadd [#allocation5], 4294964224 }
  0x69   :  { %1399 = dma.done.wait [#allocation8], 6144  }
  0x6a   :  { %1400 = vsyncadd [#allocation8], 4294961152 }
  0x6b   :  { %1401 = dma.done.wait [#allocation11], 1024  }
  0x6c   :  { %1402 = vsyncadd [#allocation11], 4294966272  ;;  %v1413_v0 = vmov 0.0   ;;  %vm1414_vm0 = vmmov 0   ;;  %v1143_v1 = vld [vmem:[#allocation2] sm:$0xff]   ;;  %v1144_v2 = vld [vmem:[#allocation2 + $0x8] sm:$0xff]  }
  0x6d   :  { %1070 = vmatprep.subr.bf16.mxu0 %v1413_v0  ;;  %1086 = vmatprep.mubr.msk.bf16.mxu0 %vm1414_vm0, %v1413_v0  ;;  %v1145_v3 = vld [vmem:[#allocation2 + $0x10] sm:$0xff]   ;;  %v1151_v4 = vld [vmem:[#allocation4] sm:$0xff]   ;;  %v1146_v5 = vld [vmem:[#allocation2 + $0x18] sm:$0xff]   ;;  %v1415_v41 = vmov 0  }
  0x6e   :  { %1090 = vmatprep.subr.bf16.mxu1 %v1413_v0  ;;  %1106 = vmatprep.mubr.msk.bf16.mxu1 %vm1414_vm0, %v1413_v0  ;;  %v1152_v6 = vld [vmem:[#allocation4 + $0x8] sm:$0xff]   ;;  %v1147_v7 = vld [vmem:[#allocation2 + $0x20] sm:$0xff]   ;;  %v1153_v8 = vld [vmem:[#allocation4 + $0x10] sm:$0xff]  }
  0x6f   :  { %1071 = vmatpush3.bf16.msra.mxu0 %v1143_v1  ;;  %1091 = vmatpush3.bf16.msra.mxu1 %v1151_v4  ;;  %v1148_v9 = vld [vmem:[#allocation2 + $0x28] sm:$0xff]   ;;  %v1154_v10 = vld [vmem:[#allocation4 + $0x18] sm:$0xff]   ;;  %v1149_v11 = vld [vmem:[#allocation2 + $0x30] sm:$0xff]  }
  0x70   :  { %1072 = vmatprep.subr.bf16.mxu0 %v1413_v0  ;;  %1092 = vmatprep.subr.bf16.mxu1 %v1413_v0  ;;  %v1155_v12 = vld [vmem:[#allocation4 + $0x20] sm:$0xff]   ;;  %v1150_v13 = vld [vmem:[#allocation2 + $0x38] sm:$0xff]   ;;  %v1156_v15 = vld [vmem:[#allocation4 + $0x28] sm:$0xff]  }
  0x71   :  { %v109_v14 = vld [vmem:[%s1590_s0] sm:$0xff]  ;;  %v1157_v17 = vld [vmem:[#allocation4 + $0x30] sm:$0xff]   ;;  %v1158_v18 = vld [vmem:[#allocation4 + $0x38] sm:$0xff]  }
  0x72   :  { %v110_v16 = vpack.c.bf16 %v109_v14, %v109_v14  ;;  %v1159_v19 = vld [vmem:[#allocation6] ss:$8 sps:$4 sm:$0xff]   ;;  %v1161_v20 = vld [vmem:[#allocation6 + $0x4] ss:$8 sps:$4 sm:$0xff]   ;;  %v1164_v21 = vld [vmem:[#allocation6 + $0x14] ss:$8 sps:$4 sm:$0xff]  }
  0x73   :  { %1073 = vmatpush3.bf16.msra.mxu0 %v1144_v2  ;;  %1093 = vmatpush3.bf16.msra.mxu1 %v1152_v6  ;;  %v1162_v22 = vld [vmem:[#allocation6 + $0x10] ss:$8 sps:$4 sm:$0xff]   ;;  %v1167_v23 = vld [vmem:[#allocation6 + $0x24] ss:$8 sps:$4 sm:$0xff]   ;;  %v1165_v24 = vld [vmem:[#allocation6 + $0x20] ss:$8 sps:$4 sm:$0xff]  }
  0x74   :  { %1074 = vmatprep.subr.bf16.mxu0 %v1413_v0  ;;  %1094 = vmatprep.subr.bf16.mxu1 %v1413_v0  ;;  %v1170_v25 = vld [vmem:[#allocation6 + $0x34] ss:$8 sps:$4 sm:$0xff]   ;;  %v1168_v26 = vld [vmem:[#allocation6 + $0x30] ss:$8 sps:$4 sm:$0xff]   ;;  %v1173_v27 = vld [vmem:[#allocation6 + $0x44] ss:$8 sps:$4 sm:$0xff]  }
  0x75   :  { %v1171_v28 = vld [vmem:[#allocation6 + $0x40] ss:$8 sps:$4 sm:$0xff]   ;;  %v1176_v29 = vld [vmem:[#allocation6 + $0x54] ss:$8 sps:$4 sm:$0xff]   ;;  %v1174_v30 = vld [vmem:[#allocation6 + $0x50] ss:$8 sps:$4 sm:$0xff]  }
  0x76   :  { %v1179_v31 = vld [vmem:[#allocation6 + $0x64] ss:$8 sps:$4 sm:$0xff]   ;;  %v1177_v32 = vld [vmem:[#allocation6 + $0x60] ss:$8 sps:$4 sm:$0xff]   ;;  %v1182_v39 = vld [vmem:[#allocation6 + $0x74] ss:$8 sps:$4 sm:$0xff]  }
  0x77   :  { %1075 = vmatpush3.bf16.msra.mxu0 %v1145_v3  ;;  %1095 = vmatpush3.bf16.msra.mxu1 %v1153_v8  ;;  %v1180_v40 = vld [vmem:[#allocation6 + $0x70] ss:$8 sps:$4 sm:$0xff]   ;;  %v1183_v42 = vld [vmem:[#allocation7] ss:$8 sps:$4 sm:$0xff]   ;;  %v1185_v43 = vld [vmem:[#allocation7 + $0x4] ss:$8 sps:$4 sm:$0xff]  }
  0x78   :  { %1076 = vmatprep.subr.bf16.mxu0 %v1413_v0  ;;  %1096 = vmatprep.subr.bf16.mxu1 %v1413_v0  ;;  %v1188_v44 = vld [vmem:[#allocation7 + $0x14] ss:$8 sps:$4 sm:$0xff]   ;;  %v1186_v45 = vld [vmem:[#allocation7 + $0x10] ss:$8 sps:$4 sm:$0xff]   ;;  %v1191_v46 = vld [vmem:[#allocation7 + $0x24] ss:$8 sps:$4 sm:$0xff]  }
  0x79   :  { %v1189_v47 = vld [vmem:[#allocation7 + $0x20] ss:$8 sps:$4 sm:$0xff]   ;;  %v1194_v48 = vld [vmem:[#allocation7 + $0x34] ss:$8 sps:$4 sm:$0xff]   ;;  %v1192_v49 = vld [vmem:[#allocation7 + $0x30] ss:$8 sps:$4 sm:$0xff]  }
  0x7a   :  { %v1197_v50 = vld [vmem:[#allocation7 + $0x44] ss:$8 sps:$4 sm:$0xff]   ;;  %v1195_v51 = vld [vmem:[#allocation7 + $0x40] ss:$8 sps:$4 sm:$0xff]   ;;  %v1200_v52 = vld [vmem:[#allocation7 + $0x54] ss:$8 sps:$4 sm:$0xff]  }
  0x7b   :  { %1077 = vmatpush3.bf16.msra.mxu0 %v1146_v5  ;;  %1097 = vmatpush3.bf16.msra.mxu1 %v1154_v10  ;;  %v1198_v53 = vld [vmem:[#allocation7 + $0x50] ss:$8 sps:$4 sm:$0xff]   ;;  %v1203_v54 = vld [vmem:[#allocation7 + $0x64] ss:$8 sps:$4 sm:$0xff]   ;;  %v1201_v55 = vld [vmem:[#allocation7 + $0x60] ss:$8 sps:$4 sm:$0xff]  }
  0x7c   :  { %1078 = vmatprep.subr.bf16.mxu0 %v1413_v0  ;;  %1098 = vmatprep.subr.bf16.mxu1 %v1413_v0  ;;  %v1206_v56 = vld [vmem:[#allocation7 + $0x74] ss:$8 sps:$4 sm:$0xff]   ;;  %v1204_v57 = vld [vmem:[#allocation7 + $0x70] ss:$8 sps:$4 sm:$0xff]   ;;  %v1209_v58 = vld [vmem:[#allocation7 + $0x84] ss:$8 sps:$4 sm:$0xff]  }
  0x7d   :  { %v1207_v59 = vld [vmem:[#allocation7 + $0x80] ss:$8 sps:$4 sm:$0xff]   ;;  %v1212_v60 = vld [vmem:[#allocation7 + $0x94] ss:$8 sps:$4 sm:$0xff]   ;;  %v1210_v61 = vld [vmem:[#allocation7 + $0x90] ss:$8 sps:$4 sm:$0xff]  }
  0x7e   :  { %v1215_v62 = vld [vmem:[#allocation7 + $0xa4] ss:$8 sps:$4 sm:$0xff]   ;;  %v1213_v63 = vld [vmem:[#allocation7 + $0xa0] ss:$8 sps:$4 sm:$0xff]   ;;  %v1218_v1 = vld [vmem:[#allocation7 + $0xb4] ss:$8 sps:$4 sm:$0xff]  }
  0x7f   :  { %1079 = vmatpush3.bf16.msra.mxu0 %v1147_v7  ;;  %1099 = vmatpush3.bf16.msra.mxu1 %v1155_v12  ;;  %v1216_v2 = vld [vmem:[#allocation7 + $0xb0] ss:$8 sps:$4 sm:$0xff]   ;;  %v1221_v3 = vld [vmem:[#allocation7 + $0xc4] ss:$8 sps:$4 sm:$0xff]   ;;  %v1219_v4 = vld [vmem:[#allocation7 + $0xc0] ss:$8 sps:$4 sm:$0xff]  }
  0x80   :  { %1080 = vmatprep.subr.bf16.mxu0 %v1413_v0  ;;  %1100 = vmatprep.subr.bf16.mxu1 %v1413_v0  ;;  %v1224_v5 = vld [vmem:[#allocation7 + $0xd4] ss:$8 sps:$4 sm:$0xff]   ;;  %v1222_v6 = vld [vmem:[#allocation7 + $0xd0] ss:$8 sps:$4 sm:$0xff]   ;;  %v1227_v7 = vld [vmem:[#allocation7 + $0xe4] ss:$8 sps:$4 sm:$0xff]  }
  0x81   :  { %v1225_v8 = vld [vmem:[#allocation7 + $0xe0] ss:$8 sps:$4 sm:$0xff]  }
  0x83   :  { %1081 = vmatpush3.bf16.msra.mxu0 %v1148_v9  ;;  %1101 = vmatpush3.bf16.msra.mxu1 %v1156_v15  ;;  %v1230_v15 = vld [vmem:[#allocation7 + $0xf4] ss:$8 sps:$4 sm:$0xff]  }
  0x84   :  { %1082 = vmatprep.subr.bf16.mxu0 %v1413_v0  ;;  %1102 = vmatprep.subr.bf16.mxu1 %v1413_v0 }
  0x87   :  { %1083 = vmatpush3.bf16.msra.mxu0 %v1149_v11  ;;  %1103 = vmatpush3.bf16.msra.mxu1 %v1157_v17  ;;  %v1231_v17 = vld [vmem:[#allocation9] ss:$8 sps:$4 sm:$0xff]  }
  0x88   :  { %1084 = vmatprep.subr.bf16.mxu0 %v1413_v0  ;;  %1104 = vmatprep.subr.bf16.mxu1 %v1413_v0 }
  0x8b   :  { %1085 = vmatpush3.bf16.msra.mxu0 %v1150_v13  ;;  %1105 = vmatpush3.bf16.msra.mxu1 %v1158_v18  ;;  %v1233_v18 = vld [vmem:[#allocation9 + $0x4] ss:$8 sps:$4 sm:$0xff]  }
  0x8c   :  { %419 = vmatprep.subr.bf16.mxu0 %v1161_v20  ;;  %656 = vmatprep.subr.bf16.mxu1 %v1185_v43  ;;  %v1234_v20 = vld [vmem:[#allocation9 + $0x10] ss:$8 sps:$4 sm:$0xff]  }
  0x8e   :  { %1087 = vmatmul.mubr.bf16.vlgmr.msra.gmra.mrb[0].mxu0 %v110_v16  ;;  %v1228_v16 = vld [vmem:[#allocation7 + $0xf0] ss:$8 sps:$4 sm:$0xff]  }
  0x8f   :  { %420 = vmatpush1.bf16.msra.mxu0 %v1159_v19  ;;  %451 = vmatprep.mubr.bf16.mxu0 %v1415_v41  ;;  %v1236_v19 = vld [vmem:[#allocation9 + $0x14] ss:$8 sps:$4 sm:$0xff]  }
  0x90   :  { %421 = vmatprep.subr.bf16.mxu0 %v1164_v21  ;;  %v1239_v21 = vld [vmem:[#allocation9 + $0x24] ss:$8 sps:$4 sm:$0xff]  }
  0x93   :  { %422 = vmatpush1.bf16.msra.mxu0 %v1162_v22  ;;  %v1237_v22 = vld [vmem:[#allocation9 + $0x20] ss:$8 sps:$4 sm:$0xff]  }
  0x94   :  { %423 = vmatprep.subr.bf16.mxu0 %v1167_v23  ;;  %v1242_v23 = vld [vmem:[#allocation9 + $0x34] ss:$8 sps:$4 sm:$0xff]  }
  0x97   :  { %424 = vmatpush1.bf16.msra.mxu0 %v1165_v24  ;;  %v1240_v24 = vld [vmem:[#allocation9 + $0x30] ss:$8 sps:$4 sm:$0xff]  }
  0x98   :  { %425 = vmatprep.subr.bf16.mxu0 %v1170_v25  ;;  %v1245_v25 = vld [vmem:[#allocation9 + $0x44] ss:$8 sps:$4 sm:$0xff]  }
  0x9b   :  { %426 = vmatpush1.bf16.msra.mxu0 %v1168_v26  ;;  %v1243_v26 = vld [vmem:[#allocation9 + $0x40] ss:$8 sps:$4 sm:$0xff]  }
  0x9c   :  { %427 = vmatprep.subr.bf16.mxu0 %v1173_v27  ;;  %v1248_v27 = vld [vmem:[#allocation9 + $0x54] ss:$8 sps:$4 sm:$0xff]  }
  0x9f   :  { %428 = vmatpush1.bf16.msra.mxu0 %v1171_v28  ;;  %v1246_v28 = vld [vmem:[#allocation9 + $0x50] ss:$8 sps:$4 sm:$0xff]  }
  0xa0   :  { %429 = vmatprep.subr.bf16.mxu0 %v1176_v29  ;;  %v1251_v29 = vld [vmem:[#allocation9 + $0x64] ss:$8 sps:$4 sm:$0xff]  }
  0xa3   :  { %430 = vmatpush1.bf16.msra.mxu0 %v1174_v30  ;;  %v1249_v30 = vld [vmem:[#allocation9 + $0x60] ss:$8 sps:$4 sm:$0xff]  }
  0xa4   :  { %431 = vmatprep.subr.bf16.mxu0 %v1179_v31 }
  0xa7   :  { %432 = vmatpush1.bf16.msra.mxu0 %v1177_v32 }
  0xa8   :  { %433 = vmatprep.subr.bf16.mxu0 %v1182_v39  ;;  %v1254_v39 = vld [vmem:[#allocation9 + $0x74] ss:$8 sps:$4 sm:$0xff]  }
  0xab   :  { %434 = vmatpush1.bf16.msra.mxu0 %v1180_v40  ;;  %v1252_v40 = vld [vmem:[#allocation9 + $0x70] ss:$8 sps:$4 sm:$0xff]  }
  0xac   :  { %796 = vmatprep.subr.bf16.mxu0 %v1233_v18 }
 0x161   :  { %v209_v33 = vpop.f32.mrb[0].mxu0 }
 0x162   :  { %v215_v34 = vmax.f32 %v209_v33, 0.0  ;;  %v1088_v35 = vpop.f32.mrb[1].mxu0 }
 0x163   :  { %v212_v36 = vpop.f32.mrb[2].mxu0 }
 0x164   :  { %v216_v37 = vpack.c.bf16 %v215_v34, %v215_v34  ;;  %v1089_v38 = vpop.f32.mrb[3].mxu0 }
 0x166   :  { %1107 = vmatmul.mubr.bf16.vlgmr.msra.gmra.mrb[0].mxu1 %v216_v37 }
 0x167   :  { %657 = vmatpush1.bf16.msra.mxu1 %v1183_v42 }
 0x168   :  { %658 = vmatprep.subr.bf16.mxu1 %v1188_v44 }
 0x16b   :  { %659 = vmatpush1.bf16.msra.mxu1 %v1186_v45 }
 0x16c   :  { %660 = vmatprep.subr.bf16.mxu1 %v1191_v46 }
 0x16f   :  { %661 = vmatpush1.bf16.msra.mxu1 %v1189_v47  ;;  %v1255_v47 = vld [vmem:[#allocation10] sm:$0xff]  }
 0x170   :  { %662 = vmatprep.subr.bf16.mxu1 %v1194_v48 }
 0x173   :  { %663 = vmatpush1.bf16.msra.mxu1 %v1192_v49  ;;  %v1256_v49 = vld [vmem:[#allocation10 + $0x8] sm:$0xff]  }
 0x174   :  { %664 = vmatprep.subr.bf16.mxu1 %v1197_v50  ;;  %v1257_v50 = vld [vmem:[#allocation10 + $0x10] sm:$0xff]  }
 0x177   :  { %665 = vmatpush1.bf16.msra.mxu1 %v1195_v51  ;;  %v1258_v51 = vld [vmem:[#allocation10 + $0x18] sm:$0xff]  }
 0x178   :  { %666 = vmatprep.subr.bf16.mxu1 %v1200_v52  ;;  %v1259_v52 = vld [vmem:[#allocation10 + $0x20] sm:$0xff]  }
 0x17b   :  { %667 = vmatpush1.bf16.msra.mxu1 %v1198_v53  ;;  %v1260_v53 = vld [vmem:[#allocation10 + $0x28] sm:$0xff]  }
 0x17c   :  { %668 = vmatprep.subr.bf16.mxu1 %v1203_v54  ;;  %v1261_v54 = vld [vmem:[#allocation10 + $0x30] sm:$0xff]  }
 0x17f   :  { %669 = vmatpush1.bf16.msra.mxu1 %v1201_v55  ;;  %v1262_v55 = vld [vmem:[#allocation10 + $0x38] sm:$0xff]  }
 0x180   :  { %670 = vmatprep.subr.bf16.mxu1 %v1206_v56 }
 0x183   :  { %671 = vmatpush1.bf16.msra.mxu1 %v1204_v57 }
 0x184   :  { %672 = vmatprep.subr.bf16.mxu1 %v1209_v58 }
 0x187   :  { %673 = vmatpush1.bf16.msra.mxu1 %v1207_v59 }
 0x188   :  { %674 = vmatprep.subr.bf16.mxu1 %v1212_v60 }
 0x18b   :  { %675 = vmatpush1.bf16.msra.mxu1 %v1210_v61 }
 0x18c   :  { %676 = vmatprep.subr.bf16.mxu1 %v1215_v62 }
 0x18f   :  { %677 = vmatpush1.bf16.msra.mxu1 %v1213_v63 }
 0x190   :  { %678 = vmatprep.subr.bf16.mxu1 %v1218_v1 }
 0x193   :  { %679 = vmatpush1.bf16.msra.mxu1 %v1216_v2 }
 0x194   :  { %680 = vmatprep.subr.bf16.mxu1 %v1221_v3 }
 0x197   :  { %681 = vmatpush1.bf16.msra.mxu1 %v1219_v4 }
 0x198   :  { %682 = vmatprep.subr.bf16.mxu1 %v1224_v5 }
 0x19b   :  { %683 = vmatpush1.bf16.msra.mxu1 %v1222_v6 }
 0x19c   :  { %684 = vmatprep.subr.bf16.mxu1 %v1227_v7 }
 0x19f   :  { %685 = vmatpush1.bf16.msra.mxu1 %v1225_v8 }
 0x1a0   :  { %686 = vmatprep.subr.bf16.mxu1 %v1230_v15 }
 0x1a3   :  { %687 = vmatpush1.bf16.msra.mxu1 %v1228_v16 }
 0x239   :  { %v315_v9 = vpop.f32.mrb[0].mxu1 }
 0x23a   :  { %v321_v10 = vmax.f32 %v315_v9, 0.0  ;;  %v1108_v11 = vpop.f32.mrb[1].mxu1 }
 0x23b   :  { %v318_v12 = vpop.f32.mrb[2].mxu1 }
 0x23c   :  { %v322_v13 = vpack.c.bf16 %v321_v10, %v321_v10  ;;  %v1109_v14 = vpop.f32.mrb[3].mxu1 }
 0x23e   :  { %452 = vmatmul.mubr.bf16.vlgmr.msra.gmra.mrb[4].mxu0 %v322_v13 }
 0x23f   :  { %828 = vmatprep.mubr.bf16.mxu0 %v1415_v41  ;;  %797 = vmatpush1.bf16.msra.mxu0 %v1231_v17 }
 0x240   :  { %798 = vmatprep.subr.bf16.mxu0 %v1236_v19 }
 0x243   :  { %799 = vmatpush1.bf16.msra.mxu0 %v1234_v20 }
 0x244   :  { %800 = vmatprep.subr.bf16.mxu0 %v1239_v21 }
 0x247   :  { %801 = vmatpush1.bf16.msra.mxu0 %v1237_v22 }
 0x248   :  { %802 = vmatprep.subr.bf16.mxu0 %v1242_v23 }
 0x24b   :  { %803 = vmatpush1.bf16.msra.mxu0 %v1240_v24 }
 0x24c   :  { %804 = vmatprep.subr.bf16.mxu0 %v1245_v25 }
 0x24f   :  { %805 = vmatpush1.bf16.msra.mxu0 %v1243_v26 }
 0x250   :  { %806 = vmatprep.subr.bf16.mxu0 %v1248_v27 }
 0x253   :  { %807 = vmatpush1.bf16.msra.mxu0 %v1246_v28 }
 0x254   :  { %808 = vmatprep.subr.bf16.mxu0 %v1251_v29 }
 0x257   :  { %809 = vmatpush1.bf16.msra.mxu0 %v1249_v30 }
 0x258   :  { %810 = vmatprep.subr.bf16.mxu0 %v1254_v39 }
 0x25b   :  { %811 = vmatpush1.bf16.msra.mxu0 %v1252_v40 }
 0x25c   :  { %1110 = vmatprep.subr.bf16.mxu0 %v1413_v0 }
 0x311   :  { %v453_v31 = vpop.f32.mrb[4].mxu0 }
 0x312   :  { %v460_v32 = vmax.f32 %v453_v31, 0.0  ;;  %v455_v33 = vpop.f32.mrb[5].mxu0 }
 0x313   :  { %v461_v34 = vmax.f32 %v455_v33, 0.0  ;;  %v457_v35 = vpop.f32.mrb[6].mxu0 }
 0x314   :  { %v458_v36 = vpop.f32.mrb[7].mxu0  ;;  %v462_v38 = vpack.c.bf16 %v460_v32, %v460_v32 }
 0x315   :  { %v463_v37 = vpack.c.bf16 %v461_v34, %v461_v34 }
 0x317   :  { %688 = vmatprep.mubr.bf16.mxu1 %v463_v37 }
 0x318   :  { %689 = vmatmul.mubr.bf16.vlgmr.msra.gmra.mrb[4].mxu1 %v462_v38 }
 0x3eb   :  { %v690_v41 = vpop.f32.mrb[4].mxu1 }
 0x3ec   :  { %v697_v42 = vmax.f32 %v690_v41, 0.0  ;;  %v692_v43 = vpop.f32.mrb[5].mxu1 }
 0x3ed   :  { %v698_v44 = vmax.f32 %v692_v43, 0.0  ;;  %v694_v45 = vpop.f32.mrb[6].mxu1 }
 0x3ee   :  { %944 = vst [vmem:[%s1597_s7] sm:$0xff] %v697_v42  ;;  %v695_v46 = vpop.f32.mrb[7].mxu1 }
 0x3ef   :  { %v699_v48 = vpack.c.bf16 %v698_v44, %v698_v44 }
 0x3f1   :  { %829 = vmatmul.mubr.bf16.vlgmr.msra.gmra.mrb[8].mxu0 %v699_v48 }
 0x3f2   :  { %1111 = vmatpush3.bf16.msra.mxu0 %v1255_v47  ;;  %1126 = vmatprep.mubr.msk.bf16.mxu0 %vm1414_vm0, %v1413_v0 }
 0x3f3   :  { %1112 = vmatprep.subr.bf16.mxu0 %v1413_v0 }
 0x3f6   :  { %1113 = vmatpush3.bf16.msra.mxu0 %v1256_v49 }
 0x3f7   :  { %1114 = vmatprep.subr.bf16.mxu0 %v1413_v0 }
 0x3fa   :  { %1115 = vmatpush3.bf16.msra.mxu0 %v1257_v50 }
 0x3fb   :  { %1116 = vmatprep.subr.bf16.mxu0 %v1413_v0 }
 0x3fe   :  { %1117 = vmatpush3.bf16.msra.mxu0 %v1258_v51 }
 0x3ff   :  { %1118 = vmatprep.subr.bf16.mxu0 %v1413_v0 }
 0x402   :  { %1119 = vmatpush3.bf16.msra.mxu0 %v1259_v52 }
 0x403   :  { %1120 = vmatprep.subr.bf16.mxu0 %v1413_v0 }
 0x406   :  { %1121 = vmatpush3.bf16.msra.mxu0 %v1260_v53 }
 0x407   :  { %1122 = vmatprep.subr.bf16.mxu0 %v1413_v0 }
 0x40a   :  { %1123 = vmatpush3.bf16.msra.mxu0 %v1261_v54 }
 0x40b   :  { %1124 = vmatprep.subr.bf16.mxu0 %v1413_v0 }
 0x40e   :  { %1125 = vmatpush3.bf16.msra.mxu0 %v1262_v55 }
 0x4c4   :  { %v830_v56 = vpop.f32.mrb[8].mxu0 }
 0x4c5   :  { %v837_v57 = vmax.f32 %v830_v56, 0.0  ;;  %v832_v58 = vpop.f32.mrb[9].mxu0 }
 0x4c6   :  { %946 = vst [vmem:[%s1597_s7 + $0x10] sm:$0xff] %v832_v58  ;;  %v834_v59 = vpop.f32.mrb[10].mxu0 }
 0x4c7   :  { %v838_v60 = vpack.c.bf16 %v837_v57, %v837_v57  ;;  %v835_v61 = vpop.f32.mrb[11].mxu0 }
 0x4c9   :  { %1127 = vmatmul.mubr.bf16.vlgmr.msra.gmra.mrb[12].mxu0 %v838_v60 }
 0x59c   :  { %v937_v62 = vpop.f32.mrb[12].mxu0 }
 0x59d   :  { %v943_v63 = vmax.f32 %v937_v62, 0.0  ;;  %v1128_v1 = vpop.f32.mrb[13].mxu0 }
 0x59e   :  { %v940_v2 = vpop.f32.mrb[14].mxu0 }
 0x59f   :  { %945 = vst [vmem:[%s1597_s7 + $0x8] sm:$0xff] %v943_v63  ;;  %v1129_v0 = vpop.f32.mrb[15].mxu0 }
 0x5a0   :  { %951 = vsyncpa [#allocation3], 1 }
 0x5a1   :  { %952 = vsyncpa [#allocation5], 1 }
 0x5a2   :  { %953 = vsyncpa [#allocation8], 1 }
 0x5a3   :  { %954 = vsyncpa [#allocation11], 1 }

</bundles_post_ra>
